<compile_context>
chip_gen: v5e
topology: v5e:2x2
jax: 0.10.0
libtpu: 0.0.40
codegen_flags: <defaults>
</compile_context>

<pallas_src>
import jax
import jax.numpy as jnp
from jax.experimental import pallas as pl
from jax.experimental.pallas import tpu as pltpu

M, K, N = 3, 2, 4          # input rows, Linear(in=2, out=4)
REPS = 6                   # stack((x,x)) then stack((y,y,y)) -> 6 copies of (3,4)
OUT_LANES = REPS * M * N   # 72


def fused_linear_replicate_kernel(x_smem, wb_ref, o_ref):
    """o[0, :] = 6 lane-concatenated copies of flatten(x @ W^T + b) — VPU only."""
    wb = wb_ref[...]                      # (3, 4): rows 0..1 = W^T, row 2 = bias
    w0 = wb[0:1, :]                       # (1, 4)
    w1 = wb[1:2, :]                       # (1, 4)
    b = wb[2:3, :]                        # (1, 4)
    # K=2 contraction per input row: two scalar*vector multiply-adds + bias.
    rows = [x_smem[2 * r] * w0 + x_smem[2 * r + 1] * w1 + b for r in range(M)]
    v12 = jnp.concatenate(rows, axis=-1)                 # (1, 12) = flatten(x@W^T+b)
    o_ref[...] = jnp.concatenate([v12] * REPS, axis=-1)  # (1, 72), one lane-dense store


def model_forward(x, weight, bias):
    """Pallas port of Model.forward: Linear(2,4) -> stack -> stack -> flatten."""
    # Pack W^T (2,4) and bias (1,4) into a single (3,4) VMEM operand.
    wb = jnp.concatenate(
        [weight.T.astype(jnp.float32), bias.reshape(1, N).astype(jnp.float32)],
        axis=0)                                           # (3, 4)
    x_flat = x.reshape(-1).astype(jnp.float32)            # (6,) scalars -> SMEM
    out = pl.pallas_call(
        fused_linear_replicate_kernel,
        out_shape=jax.ShapeDtypeStruct((1, OUT_LANES), jnp.float32),
        in_specs=[
            pl.BlockSpec(memory_space=pltpu.MemorySpace.SMEM),   # x scalars (f32[6])
            pl.BlockSpec(memory_space=pltpu.MemorySpace.VMEM),   # [W^T; bias] (3,4)
        ],
        out_specs=pl.BlockSpec(memory_space=pltpu.MemorySpace.VMEM),
    )(x_flat, wb)
    # (1,72) == flatten(stack(stack(x@W^T+b))) — nothing left to reshape.
    # TODO(synk): original q.reshape((1, 18)) is shape-invalid for 72 elements;
    # keeping the previously validated (1, 72) substitution.
    return out


if __name__ == "__main__":
    key = jax.random.PRNGKey(0)
    kx, kw, kb = jax.random.split(key, 3)

    # Deterministic inputs / parameters (Linear(in=2, out=4), x of shape (3,2)).
    x = jax.random.normal(kx, (3, 2), dtype=jnp.float32)
    weight = jax.random.normal(kw, (4, 2), dtype=jnp.float32) * 0.5
    bias = jax.random.normal(kb, (4,), dtype=jnp.float32) * 0.1

    fwd = jax.jit(model_forward)
    out = fwd(x, weight, bias)
    jax.block_until_ready(out)

    # Pure-JAX reference mirroring the original module step by step.
    x_lin = x @ weight.T + bias
    y = jnp.stack((x_lin, x_lin), axis=0)        # (2,3,4)
    z = jnp.stack((y, y, y), axis=0)             # (3,2,3,4)
    q = z.reshape(z.shape[0], -1)                # (3,24)
    ref = q.reshape(1, -1)                       # (1,72)

    assert out.shape == (1, 72)
    assert jnp.allclose(out, ref, atol=1e-5, rtol=1e-5), "mismatch vs reference"
    print("KERNEL_OK")
</pallas_src>

<mosaic_0001>
module attributes {stable_mosaic.version = 11 : i64} {
  func.func @fused_linear_replicate_kernel(%arg0: memref<6xf32, #tpu.memory_space<smem>>, %arg1: memref<3x4xf32, #tpu.memory_space<vmem>>, %arg2: memref<1x72xf32, #tpu.memory_space<vmem>>) attributes {dimension_semantics = [], scalar_prefetch = 0 : i64, scratch_operands = 0 : i64, tpu.core_type = #tpu.core_type<tc>} {
    %c0 = arith.constant 0 : index
    %c0_0 = arith.constant 0 : index
    %0 = vector.load %arg1[%c0, %c0_0] : memref<3x4xf32, #tpu.memory_space<vmem>>, vector<3x4xf32>
    %1 = vector.extract_strided_slice %0 {offsets = [0, 0], sizes = [1, 4], strides = [1, 1]} : vector<3x4xf32> to vector<1x4xf32>
    %2 = vector.extract_strided_slice %0 {offsets = [1, 0], sizes = [1, 4], strides = [1, 1]} : vector<3x4xf32> to vector<1x4xf32>
    %3 = vector.extract_strided_slice %0 {offsets = [2, 0], sizes = [1, 4], strides = [1, 1]} : vector<3x4xf32> to vector<1x4xf32>
    %c0_1 = arith.constant 0 : index
    %4 = memref.load %arg0[%c0_1] : memref<6xf32, #tpu.memory_space<smem>>
    %5 = vector.broadcast %4 : f32 to vector<1x4xf32>
    %6 = arith.mulf %5, %1 : vector<1x4xf32>
    %c1 = arith.constant 1 : index
    %7 = memref.load %arg0[%c1] : memref<6xf32, #tpu.memory_space<smem>>
    %8 = vector.broadcast %7 : f32 to vector<1x4xf32>
    %9 = arith.mulf %8, %2 : vector<1x4xf32>
    %10 = arith.addf %6, %9 : vector<1x4xf32>
    %11 = arith.addf %10, %3 : vector<1x4xf32>
    %c2 = arith.constant 2 : index
    %12 = memref.load %arg0[%c2] : memref<6xf32, #tpu.memory_space<smem>>
    %13 = vector.broadcast %12 : f32 to vector<1x4xf32>
    %14 = arith.mulf %13, %1 : vector<1x4xf32>
    %c3 = arith.constant 3 : index
    %15 = memref.load %arg0[%c3] : memref<6xf32, #tpu.memory_space<smem>>
    %16 = vector.broadcast %15 : f32 to vector<1x4xf32>
    %17 = arith.mulf %16, %2 : vector<1x4xf32>
    %18 = arith.addf %14, %17 : vector<1x4xf32>
    %19 = arith.addf %18, %3 : vector<1x4xf32>
    %c4 = arith.constant 4 : index
    %20 = memref.load %arg0[%c4] : memref<6xf32, #tpu.memory_space<smem>>
    %21 = vector.broadcast %20 : f32 to vector<1x4xf32>
    %22 = arith.mulf %21, %1 : vector<1x4xf32>
    %c5 = arith.constant 5 : index
    %23 = memref.load %arg0[%c5] : memref<6xf32, #tpu.memory_space<smem>>
    %24 = vector.broadcast %23 : f32 to vector<1x4xf32>
    %25 = arith.mulf %24, %2 : vector<1x4xf32>
    %26 = arith.addf %22, %25 : vector<1x4xf32>
    %27 = arith.addf %26, %3 : vector<1x4xf32>
    %28 = tpu.concatenate %11, %19, %27 in 1 : vector<1x4xf32>, vector<1x4xf32>, vector<1x4xf32> -> vector<1x12xf32>
    %29 = tpu.concatenate %28, %28, %28, %28, %28, %28 in 1 : vector<1x12xf32>, vector<1x12xf32>, vector<1x12xf32>, vector<1x12xf32>, vector<1x12xf32>, vector<1x12xf32> -> vector<1x72xf32>
    %c0_2 = arith.constant 0 : index
    %c0_3 = arith.constant 0 : index
    %30 = vector.load %arg2[%c0_2, %c0_3] : memref<1x72xf32, #tpu.memory_space<vmem>>, vector<1x72xf32>
    tpu.vector_store %arg2[%c0_2, %c0_3], %29 {strides = array<i32>} : memref<1x72xf32, #tpu.memory_space<vmem>>, vector<1x72xf32>,
    return
  }
}

</mosaic_0001>

<bundles_post_ra>
// kernel: model_forward.1
= control target key start
LH: loop header
LB: loop body
LE: loop exit
PB: predicated region body
PF: predicated region fallthrough
CT: control target
= control target key end

     0   :  { %7 = vsyncpa [#allocation4], 0  ;;  %s206_s0 = inlined_call_operand.vmem [shape: f32[6], index: 0, kind: input, shape index: {}]   ;;  %s207_s1 = inlined_call_operand.vmem [shape: f32[3,4], index: 1, kind: input, shape index: {}]   ;;  %s208_s2 = inlined_call_operand.hbm [shape: f32[1,72], index: 2, kind: output, shape index: {}]  }
   0x1   :  { %8 = vsyncpa [#allocation3], 0  ;;  %s14_s11 = sshll.u32 %s206_s0, 4  ;;  %s173_s12 = smov [#allocation2]   ;;  %s15_s11 = int_to_ptr.vmem [resolvable:$true] %s14_s11 }
   0x2   :  { %17 = dma.vmem_to_smem %s15_s11, 16, %s173_s12, [#allocation4]  }
   0x3   :  { %169 = dma.done.wait [#allocation4], 16  }
   0x4   :  { %170 = vsyncadd [#allocation4], 4294967280 }
   0x5   :  { %24 = sfence }
   0x6   :  { %s120_s13 = sld [smem:[#allocation2 + $0x2]]  ;;  %v25_v0 = vld [vmem:[%s207_s1] sm:$0x7]  ;;  %s174_s0 = smov 4   ;;  %vm70_vm0 = vcmask 31744   ;;  %vm72_vm1 = vcmask 64512  }
   0x7   :  { %s121_s14 = sld [smem:[#allocation2 + $0x3]]  ;;  %v37_v7 = vrot.slane %v25_v0, 2  ;;  %s175_s19 = smov 8   ;;  %vm90_vm2 = vcmask 97280   ;;  %vm92_vm3 = vcmask 195584   ;;  %vm94_vm4 = vcmask 293888  }
   0x8   :  { %s122_s15 = sld [smem:[#allocation2 + $0x4]]  ;;  %s176_s21 = smov 60   ;;  %vm96_vm5 = vcmask 392192   ;;  %vm98_vm6 = vcmask 490496   ;;  %vm100_vm7 = vcmask 581632  }
   0x9   :  { %s123_s16 = sld [smem:[#allocation2 + $0x5]]  ;;  %s177_s22 = smov 36  }
   0xa   :  { %s119_s1 = sld [smem:[#allocation2 + $0x1]]  ;;  %s178_s23 = smov 12  }
   0xb   :  { %s26_s20 = sld [smem:[#allocation2]]  ;;  %s179_s24 = smov 48  }
   0xc   :  { %v41_v1 = vstv %s120_s13  ;;  %s180_s25 = smov 24   ;;  %s181_s26 = smov [#allocation5]  }
   0xd   :  { %v44_v2 = vstv %s121_s14  ;;  %v42_v3 = vmul.f32 %v41_v1, %v25_v0  ;;  %s107_s27 = sshll.u32 %s181_s26, 4  ;;  %s109_s30 = sshll.u32 %s208_s2, 4  ;;  %s108_s27 = int_to_ptr.vmem [resolvable:$true] %s107_s27  ;;  %s110_s30 = int_to_ptr.hbm [resolvable:$true] %s109_s30 }
   0xe   :  { %v45_v4 = vmul.f32 %v44_v2, %v25_v0  ;;  %v52_v5 = vstv %s122_s15 }
   0xf   :  { %v55_v6 = vstv %s123_s16  ;;  %v53_v11 = vmul.f32 %v52_v5, %v25_v0 }
  0x10   :  { %v47_v8 = vrot.slane %v45_v4, 1  ;;  %v56_v9 = vmul.f32 %v55_v6, %v25_v0  ;;  %v30_v16 = vstv %s119_s1 }
  0x11   :  { %v31_v17 = vmul.f32 %v30_v16, %v25_v0  ;;  %v27_v18 = vstv %s26_s20 }
  0x12   :  { %v49_v10 = vadd.f32 %v47_v8, %v42_v3  ;;  %v58_v12 = vrot.slane %v56_v9, 1  ;;  %v28_v19 = vmul.f32 %v27_v18, %v25_v0 }
  0x13   :  { %v33_v20 = vrot.slane %v31_v17, 1 }
  0x14   :  { %v50_v13 = vadd.f32 %v49_v10, %v37_v7  ;;  %v60_v14 = vadd.f32 %v58_v12, %v53_v11 }
  0x15   :  { %v35_v22 = vadd.f32 %v33_v20, %v28_v19 }
  0x16   :  { %63 = vrot.lane.b32.xlu0 %v50_v13, %s174_s0  ;;  %v61_v15 = vadd.f32 %v60_v14, %v37_v7 }
  0x17   :  { %v39_v23 = vadd.f32 %v37_v7, %v35_v22 }
  0x1e   :  { %67 = vrot.lane.b32.xlu0 %v61_v15, %s175_s19 }
  0x88   :  { %v64_v21 = vpop.permute.xlu0 %63 }
  0x89   :  { %v71_v24 = vsel %vm70_vm0, %v39_v23, %v64_v21 }
  0x90   :  { %v68_v25 = vpop.permute.xlu0 %67 }
  0x91   :  { %v73_v26 = vsel %vm72_vm1, %v71_v24, %v68_v25 }
  0x92   :  { %87 = vrot.lane.b32.xlu0 %v73_v26, %s176_s21  ;;  %81 = vrot.lane.b32.xlu2 %v73_v26, %s177_s22 }
  0x93   :  { %75 = vrot.lane.b32.xlu1 %v73_v26, %s178_s23 }
  0x9a   :  { %84 = vrot.lane.b32.xlu2 %v73_v26, %s179_s24 }
  0x9b   :  { %78 = vrot.lane.b32.xlu1 %v73_v26, %s180_s25 }
  0xec   :  { %v82_v27 = vpop.permute.xlu2 %81 }
  0xf4   :  { %v85_v32 = vpop.permute.xlu2 %84 }
 0x104   :  { %v88_v34 = vpop.permute.xlu0 %87 }
 0x105   :  { %v76_v28 = vpop.permute.xlu1 %75 }
 0x106   :  { %v91_v29 = vsel %vm90_vm2, %v73_v26, %v76_v28 }
 0x10d   :  { %v79_v30 = vpop.permute.xlu1 %78 }
 0x10e   :  { %v93_v31 = vsel %vm92_vm3, %v91_v29, %v79_v30 }
 0x10f   :  { %v95_v33 = vsel %vm94_vm4, %v93_v31, %v82_v27 }
 0x110   :  { %v97_v35 = vsel %vm96_vm5, %v95_v33, %v85_v32 }
 0x111   :  { %v99_v36 = vsel %vm98_vm6, %v97_v35, %v88_v34 }
 0x112   :  { %101 = vst.msk [vmem:[#allocation5] sm:$0x1] %vm100_vm7, %v99_v36 }
 0x113   :  { %112 = dma.vmem_to_hbm [thread:$0]  %s108_s27, 16, %s110_s30, [#allocation3]  }
 0x114   :  { %171 = dma.done.wait [#allocation3], 16  }
 0x115   :  { %172 = vsyncadd [#allocation3], 4294967280 }
 0x116   :  { %117 = vsyncpa [#allocation3], 1 }
 0x117   :  { %118 = vsyncpa [#allocation4], 1 }

</bundles_post_ra>
